<compile_context>
chip_gen: v7x
topology: tpu7x:2x2x1
jax: 0.10.0
libtpu: 0.0.40
codegen_flags: <defaults>
</compile_context>

<pallas_src>
import functools

import jax
import jax.numpy as jnp
from jax.experimental import pallas as pl
from jax.experimental.pallas import tpu as pltpu


def _tt_conv_kernel(x_ref, wh_ref, wg_ref, b_ref, o_ref, *,
                    Wp, Hout1, KH, KW, dh, dw, tail, sh):
    """One batch block (TB images) per grid step; data is (rank, flat spatial)."""
    TB, Cin, _ = x_ref.shape
    r2 = wh_ref.shape[0]
    L3 = Hout1 * Wp                  # stride-1 flat output length
    L2 = L3 + tail                   # stage-A slab keeps `tail` extra columns
    Hout = (Hout1 - 1) // sh + 1     # H rows actually kept (stride sh)
    Lout = Hout * Wp

    for i in range(TB):              # static unroll over the batch block
        x = x_ref[i]                 # (Cin, SF) bf16, zero-padded, H*W flattened

        # ---- Stage A: 1D conv along H, taps stacked into the MXU K dim ----
        # An H tap is a *contiguous* slice of the flat spatial axis (offset
        # kh*dh*Wp), so the stacked RHS is just KH lane-offset slices.
        xs = jnp.concatenate(
            [jax.lax.slice(x, (0, kh * dh * Wp), (Cin, kh * dh * Wp + L2))
             for kh in range(KH)], axis=0)                        # (KH*Cin, L2)
        z = jnp.dot(wh_ref[...], xs,
                    preferred_element_type=jnp.float32)           # (r2, L2) f32

        # ---- H-stride decimation before the big matmul / output store ------
        if sh > 1:
            rows = [jax.lax.slice(z, (0, h * sh * Wp), (r2, h * sh * Wp + Wp))
                    for h in range(Hout)]
            if tail:
                rows.append(jnp.zeros((r2, tail), jnp.float32))
            z = jnp.concatenate(rows, axis=1)                     # (r2, Lout+tail)

        # ---- Stage B: W conv + Cout projection, taps stacked into K --------
        # W taps are kw*dw lane offsets; the cross-row wrap only contaminates
        # columns w >= Wout1 of each row, which the wrapper slices off.
        zs = jnp.concatenate(
            [jax.lax.slice(z, (0, kw * dw), (r2, kw * dw + Lout))
             for kw in range(KW)], axis=0)                        # (KW*r2, Lout)
        out = jnp.dot(wg_ref[...], zs,
                      preferred_element_type=jnp.float32) + b_ref[...]
        o_ref[i] = out.astype(o_ref.dtype)


def tt_tensorly_forward(x_nchw, factors, bias,
                        stride=(1, 1), padding=(1, 1), dilation=(1, 1),
                        compute_dtype=jnp.bfloat16):
    """Forward pass of tt_tensorly_model (groups=1, padding_mode='zeros')."""
    f0, f1, f2, f3 = factors          # (1,Cin,r1) (r1,KH,r2) (r2,KW,r3) (r3,Cout,1)
    B, Cin, H, W = x_nchw.shape
    KH, r2 = f1.shape[1], f1.shape[2]
    KW = f2.shape[1]
    Cout = f3.shape[1]
    sh, sw = stride
    ph, pw = padding
    dh, dw = dilation

    Hp, Wp = H + 2 * ph, W + 2 * pw
    Hout1 = Hp - dh * (KH - 1)        # stride-1 output extents
    Wout1 = Wp - dw * (KW - 1)
    Hout = (Hout1 - 1) // sh + 1      # rows kept by the kernel (H stride)
    tail = dw * (KW - 1)              # extra flat columns needed by the W taps
    extra_rows = -(-tail // Wp) if tail else 0
    SF = (Hp + extra_rows) * Wp
    Lout = Hout * Wp
    L2 = Hout1 * Wp + tail

    # ---- fold adjacent TT factors (tiny host-side einsums), stack taps in K --
    # h[kh] = f1[:,kh,:].T @ f0[0].T : (KH, r2, Cin)
    # g[kw] = f3[:,:,0].T @ f2[:,kw,:].T : (KW, Cout, r2)
    h = jnp.einsum('akb,ca->kbc', f1, f0[0])
    g = jnp.einsum('do,bkd->kob', f3[:, :, 0], f2)
    wh = jnp.transpose(h, (1, 0, 2)).reshape(r2, KH * Cin).astype(compute_dtype)
    wg = jnp.transpose(g, (1, 0, 2)).reshape(Cout, KW * r2).astype(jnp.float32)
    b2 = bias.reshape(Cout, 1).astype(jnp.float32)

    # ---- batch blocking: TB images per grid step, >=2 steps when B>=2 -------
    TB = max(1, min(8, B // 2)) if B > 1 else 1
    Bpad = -(-B // TB) * TB

    # Native NCHW in. Zero-pad spatially (padding_mode='zeros'; plus extra zero
    # rows so every in-kernel tap slice stays in bounds), pad batch to a TB
    # multiple, flatten H*W into the lane dimension, cast to bf16.
    x = jnp.pad(x_nchw, ((0, Bpad - B), (0, 0), (ph, ph + extra_rows), (pw, pw)))
    x = x.reshape(Bpad, Cin, SF).astype(compute_dtype)

    kernel = functools.partial(
        _tt_conv_kernel, Wp=Wp, Hout1=Hout1, KH=KH, KW=KW, dh=dh, dw=dw,
        tail=tail, sh=sh)

    # Explicit VMEM budget: double-buffered in/out blocks + in-kernel slabs.
    esize = jnp.dtype(compute_dtype).itemsize
    est = (2 * TB * Cin * SF * esize + 2 * TB * Cout * Lout * esize
           + TB * (KH * Cin * L2 * esize + r2 * L2 * 4
                   + KW * r2 * (Lout + tail) * 4 + Cout * Lout * 4)
           + (4 << 20))
    vmem_limit = int(min(64 << 20, max(32 << 20, est)))

    out = pl.pallas_call(
        kernel,
        out_shape=jax.ShapeDtypeStruct((Bpad, Cout, Lout), compute_dtype),
        grid_spec=pltpu.PrefetchScalarGridSpec(
            num_scalar_prefetch=0,
            grid=(Bpad // TB,),
            in_specs=[
                pl.BlockSpec((TB, Cin, SF), lambda b: (b, 0, 0)),
                pl.BlockSpec((r2, KH * Cin), lambda b: (0, 0)),
                pl.BlockSpec((Cout, KW * r2), lambda b: (0, 0)),
                pl.BlockSpec((Cout, 1), lambda b: (0, 0)),
            ],
            out_specs=pl.BlockSpec((TB, Cout, Lout), lambda b: (b, 0, 0)),
        ),
        compiler_params=pltpu.CompilerParams(
            dimension_semantics=("parallel",),
            vmem_limit_bytes=vmem_limit),
    )(x, wh, wg, b2)

    # (Bpad, Cout, Hout*Wp) -> NCHW: reshape is free, slices are tiny.
    out = out[:B].reshape(B, Cout, Hout, Wp)[:, :, :, :Wout1]
    if sw != 1:
        # TODO(synk): W stride is still decimated here; in-kernel W decimation
        # needs a lane-subsampling layout (H on sublanes) and is not done yet.
        out = out[:, :, :, ::sw]
    return out.astype(x_nchw.dtype)


def reference_conv(x_nchw, factors, bias, stride, padding, dilation):
    """Pure-JAX f32 reference: reconstruct the full Conv2d weight from TT factors."""
    f0, f1, f2, f3 = factors
    w_full = jnp.einsum('aib,bjc,ckd,dof->oijk', f0, f1, f2, f3)  # (Cout,Cin,KH,KW)
    out = jax.lax.conv_general_dilated(
        x_nchw, w_full, window_strides=stride,
        padding=[(padding[0], padding[0]), (padding[1], padding[1])],
        rhs_dilation=dilation,
        dimension_numbers=('NCHW', 'OIHW', 'NCHW'),
        precision=jax.lax.Precision.HIGHEST)
    return out + bias[None, :, None, None]


if __name__ == "__main__":
    # Small shapes consistent with the module: Conv2d-like TT conv.
    B, Cin, H, W = 2, 4, 16, 16
    Cout, K = 8, 3
    # integer rank=4 -> tensorly TT ranks (1, 4, 4, 4, 1) over (Cin, KH, KW, Cout)
    rank_int = (1, 4, 4, 4, 1)

    key = jax.random.PRNGKey(0)
    kx, k0, k1, k2, k3, kb = jax.random.split(key, 6)
    x = jax.random.normal(kx, (B, Cin, H, W), jnp.float32)
    # TT factors of the (Cin, KH, KW, Cout) kernel tensor (decompose_weights=False
    # => factors are freshly initialized, not loaded from a checkpoint).
    f0 = 0.3 * jax.random.normal(k0, (rank_int[0], Cin, rank_int[1]), jnp.float32)
    f1 = 0.3 * jax.random.normal(k1, (rank_int[1], K, rank_int[2]), jnp.float32)
    f2 = 0.3 * jax.random.normal(k2, (rank_int[2], K, rank_int[3]), jnp.float32)
    f3 = 0.3 * jax.random.normal(k3, (rank_int[3], Cout, rank_int[4]), jnp.float32)
    bias = 0.1 * jax.random.normal(kb, (Cout,), jnp.float32)
    factors = (f0, f1, f2, f3)

    configs = [
        ((1, 1), (1, 1), (1, 1)),   # default module config (stride=1, pad=1)
        ((2, 2), (2, 2), (2, 2)),   # strided + dilated variant
    ]
    for stride, padding, dilation in configs:
        out = tt_tensorly_forward(x, factors, bias, stride, padding, dilation)
        out = jax.block_until_ready(out)
        ref = reference_conv(x, factors, bias, stride, padding, dilation)
        assert out.shape == ref.shape, (out.shape, ref.shape)
        # bf16 inputs/weights/output with f32 accumulation -> ~1e-2 level error.
        err = float(jnp.max(jnp.abs(out - ref)))
        assert jnp.allclose(out, ref, rtol=3e-2, atol=3e-2), err
    print("KERNEL_OK")
</pallas_src>

<mosaic_0001>
module attributes {stable_mosaic.version = 11 : i64} {
  func.func @_tt_conv_kernel(%arg0: i32, %arg1: memref<1x4x342xbf16, #tpu.memory_space<vmem>>, %arg2: memref<4x12xbf16, #tpu.memory_space<vmem>>, %arg3: memref<8x12xf32, #tpu.memory_space<vmem>>, %arg4: memref<8x1xf32, #tpu.memory_space<vmem>>, %arg5: memref<1x8x288xbf16, #tpu.memory_space<vmem>>) attributes {dimension_semantics = [#tpu.dimension_semantics<parallel>], iteration_bounds = array<i64: 2>, scalar_prefetch = 0 : i64, scratch_operands = 0 : i64, tpu.core_type = #tpu.core_type<tc>, window_params = [{transform_indices = @transform_0, window_bounds = array<i64: 1, 4, 342>}, {pipeline_mode = #tpu.pipeline_mode<synchronous>, transform_indices = @transform_1, window_bounds = array<i64: 4, 12>}, {pipeline_mode = #tpu.pipeline_mode<synchronous>, transform_indices = @transform_2, window_bounds = array<i64: 8, 12>}, {pipeline_mode = #tpu.pipeline_mode<synchronous>, transform_indices = @transform_3, window_bounds = array<i64: 8, 1>}, {transform_indices = @transform_4, window_bounds = array<i64: 1, 8, 288>}]} {
    %c0 = arith.constant 0 : index
    %c0_0 = arith.constant 0 : index
    %c0_1 = arith.constant 0 : index
    %0 = vector.load %arg1[%c0, %c0_0, %c0_1] : memref<1x4x342xbf16, #tpu.memory_space<vmem>>, vector<1x4x342xbf16>
    %1 = vector.shape_cast %0 : vector<1x4x342xbf16> to vector<4x342xbf16>
    %2 = vector.extract_strided_slice %1 {offsets = [0, 0], sizes = [4, 290], strides = [1, 1]} : vector<4x342xbf16> to vector<4x290xbf16>
    %3 = vector.extract_strided_slice %1 {offsets = [0, 18], sizes = [4, 290], strides = [1, 1]} : vector<4x342xbf16> to vector<4x290xbf16>
    %4 = vector.extract_strided_slice %1 {offsets = [0, 36], sizes = [4, 290], strides = [1, 1]} : vector<4x342xbf16> to vector<4x290xbf16>
    %5 = tpu.concatenate %2, %3, %4 in 0 : vector<4x290xbf16>, vector<4x290xbf16>, vector<4x290xbf16> -> vector<12x290xbf16>
    %c0_2 = arith.constant 0 : index
    %c0_3 = arith.constant 0 : index
    %6 = vector.load %arg2[%c0_2, %c0_3] : memref<4x12xbf16, #tpu.memory_space<vmem>>, vector<4x12xbf16>
    %cst = arith.constant dense<0.000000e+00> : vector<4x290xf32>
    %7 = tpu.matmul %6, %5, %cst {dimension_numbers = #tpu.dot_dimension_numbers<[1], [0], [0], [1], [0, 0, 1, 1], [], []>} : vector<4x12xbf16>, vector<12x290xbf16>, vector<4x290xf32> -> vector<4x290xf32>
    %8 = vector.extract_strided_slice %7 {offsets = [0, 0], sizes = [4, 288], strides = [1, 1]} : vector<4x290xf32> to vector<4x288xf32>
    %9 = vector.extract_strided_slice %7 {offsets = [0, 1], sizes = [4, 288], strides = [1, 1]} : vector<4x290xf32> to vector<4x288xf32>
    %10 = vector.extract_strided_slice %7 {offsets = [0, 2], sizes = [4, 288], strides = [1, 1]} : vector<4x290xf32> to vector<4x288xf32>
    %11 = tpu.concatenate %8, %9, %10 in 0 : vector<4x288xf32>, vector<4x288xf32>, vector<4x288xf32> -> vector<12x288xf32>
    %c0_4 = arith.constant 0 : index
    %c0_5 = arith.constant 0 : index
    %12 = vector.load %arg3[%c0_4, %c0_5] : memref<8x12xf32, #tpu.memory_space<vmem>>, vector<8x12xf32>
    %cst_6 = arith.constant dense<0.000000e+00> : vector<8x288xf32>
    %13 = tpu.matmul %12, %11, %cst_6 {dimension_numbers = #tpu.dot_dimension_numbers<[1], [0], [0], [1], [0, 0, 1, 1], [], []>} : vector<8x12xf32>, vector<12x288xf32>, vector<8x288xf32> -> vector<8x288xf32>
    %c0_7 = arith.constant 0 : index
    %c0_8 = arith.constant 0 : index
    %14 = vector.load %arg4[%c0_7, %c0_8] : memref<8x1xf32, #tpu.memory_space<vmem>>, vector<8x1xf32>
    %15 = vector.broadcast %14 : vector<8x1xf32> to vector<8x288xf32>
    %16 = arith.addf %13, %15 : vector<8x288xf32>
    %17 = arith.truncf %16 : vector<8x288xf32> to vector<8x288xbf16>
    %c0_9 = arith.constant 0 : index
    %c0_10 = arith.constant 0 : index
    %c0_11 = arith.constant 0 : index
    %18 = vector.load %arg5[%c0_9, %c0_10, %c0_11] : memref<1x8x288xbf16, #tpu.memory_space<vmem>>, vector<1x8x288xbf16>
    %19 = vector.shape_cast %18 : vector<1x8x288xbf16> to vector<8x288xbf16>
    %20 = vector.shape_cast %17 : vector<8x288xbf16> to vector<1x8x288xbf16>
    tpu.vector_store %arg5[%c0_9, %c0_10, %c0_11], %20 {strides = array<i32>} : memref<1x8x288xbf16, #tpu.memory_space<vmem>>, vector<1x8x288xbf16>,
    return
  }
  func.func @transform_0(%arg0: i32) -> (i32, i32, i32) {
    %c0_i32 = arith.constant 0 : i32
    %c0_i32_0 = arith.constant 0 : i32
    %c0_i32_1 = arith.constant 0 : i32
    return %arg0, %c0_i32, %c0_i32_0 : i32, i32, i32
  }
  func.func @transform_1(%arg0: i32) -> (i32, i32) {
    %c0_i32 = arith.constant 0 : i32
    %c0_i32_0 = arith.constant 0 : i32
    %c0_i32_1 = arith.constant 0 : i32
    return %c0_i32, %c0_i32_0 : i32, i32
  }
  func.func @transform_2(%arg0: i32) -> (i32, i32) {
    %c0_i32 = arith.constant 0 : i32
    %c0_i32_0 = arith.constant 0 : i32
    %c0_i32_1 = arith.constant 0 : i32
    return %c0_i32, %c0_i32_0 : i32, i32
  }
  func.func @transform_3(%arg0: i32) -> (i32, i32) {
    %c0_i32 = arith.constant 0 : i32
    %c0_i32_0 = arith.constant 0 : i32
    %c0_i32_1 = arith.constant 0 : i32
    return %c0_i32, %c0_i32_0 : i32, i32
  }
  func.func @transform_4(%arg0: i32) -> (i32, i32, i32) {
    %c0_i32 = arith.constant 0 : i32
    %c0_i32_0 = arith.constant 0 : i32
    %c0_i32_1 = arith.constant 0 : i32
    return %arg0, %c0_i32, %c0_i32_0 : i32, i32, i32
  }
}

</mosaic_0001>

<bundles_post_ra>
// kernel: tpu_custom_call.1
= control target key start
LH: loop header
LB: loop body
LE: loop exit
PB: predicated region body
PF: predicated region fallthrough
CT: control target
= control target key end

     0   :  { %9 = vsyncpa [#allocation3], 0  ;;  %s1101_s0 = inlined_call_operand.hbm [shape: bf16[2,4,342], index: 0, kind: input, shape index: {}]   ;;  %s1102_s1 = inlined_call_operand.vmem [shape: bf16[4,12], index: 1, kind: input, shape index: {}]   ;;  %s1103_s2 = inlined_call_operand.vmem [shape: f32[8,12], index: 2, kind: input, shape index: {}]   ;;  %s1104_s3 = inlined_call_operand.vmem [shape: f32[8,1], index: 3, kind: input, shape index: {}]   ;;  %s1105_s4 = inlined_call_operand.hbm [shape: bf16[2,8,288], index: 4, kind: output, shape index: {}]  }
   0x1   :  { %11 = vsyncpa [#allocation3 + $0x1], 0 }
   0x2   :  { %12 = vsyncpa [#allocation4], 0 }
   0x3   :  { %14 = vsyncpa [#allocation4 + $0x1], 0  ;;  %s917_s15 = smov 0   ;;  %s919_s16 = smov 0  }
   0x4   :  { %s921_s17 = smov 0   ;;  %s923_s18 = smov 0  }
   0x5 LB: > { %s938_s19 = sadd.s32 4294967295, %s878_s18   ;;  %s660_s20 = sadd.s32 4294967294, %s878_s18   ;;  %s878_s18 = sphi %s923_s18, %s1119_s18   ;;  %s874_s17 = sphi %s921_s17, %s1118_s17   ;;  %s870_s16 = sphi %s919_s16, %s1117_s16   ;;  %s866_s15 = sphi %s917_s15, %s1116_s15  }
   0x6   : > { %s942_s21 = sadd.s32 1, %s878_s18   ;;  %s27_s22 = sadd.s32 1, %s874_s17 }
   0x7   : > { %s24_s23 = ssub.s32 %s878_s18, %s942_s21  ;;  %p34_p0 = scmp.ne.s32.totalorder %s874_s17, %s870_s16 }
   0x8   : > { %p25_p1 = scmp.eq.s32.totalorder %s24_s23, 0  ;;  %p35_p2 = scmp.eq.s32.totalorder %s878_s18, 0 }
   0x9   : > { %p40_p3 = scmp.ne.s32.totalorder %s870_s16, %s866_s15  ;;  %p41_p4 = scmp.eq.s32.totalorder %s938_s19, 0 }
   0xa   : > { %s954_s24 = scalar_select %p25_p1, %s874_s17, %s27_s22  }
   0xb   : > { %p36_p5 = por %p35_p2, %p34_p0  ;;  %p956_p6 = por %p41_p4, %p40_p3 }
   0xc   : > { %p127_p7 = scmp.eq.s32.totalorder %s938_s19, 1  ;;  %p133_p8 = scmp.eq.s32.totalorder %s660_s20, 1 }
   0xd   : > { %p725_p10 = scmp.lt.s32.totalorder %s878_s18, 2  ;;  %s162_s28 = sand.u32 1, %s874_s17  }
   0xe   : > { %p963_p11 = por %p127_p7, %p34_p0  ;;  %p967_p12 = por %p133_p8, %p40_p3 }
   0xf   : > { %s709_s29 = smul.u32 96, %s878_s18  ;;  %p978_p13 = pnand %p725_p10, %p36_p5 }
  0x10   : > { %s1108_s26 = scalar_select %p963_p11, 1, 0 }
  0x11   : > { %s1109_s27 = scalar_select %p967_p12, 1, 0 }
  0x12   : > { %s708_s30 = smul.u32 6, %s162_s28  ;;  %s976_s7 = scalar_lea.hbm %s1101_s0, %s709_s29 }
  0x13   : > { %s163_s11 = scalar_lea.sflag [#allocation3], %s162_s28  ;;  %s782_s12 = scalar_lea.hbm %s976_s7, 96 }
  0x14   : > { %s166_s9 = scalar_lea.vmem [#allocation2], %s708_s30  ;;  %p783_p2 = scmp.ne.s32.totalorder %s976_s7, %s782_s12 }
  0x15   : > { %s174_s10 = sshll.u32 %s166_s9, 4  ;;  %p784_p3 = pneg %p978_p13  ;;  %s983_s10 = int_to_ptr.vmem [resolvable:$true] %s174_s10 }
  0x16   : > { %s787_s20 = scalar_lea.hbm %s1101_s0, 192  ;;  %p788_p7 = scmp.lt.u32.totalorder %s976_s7, %s1101_s0 }
  0x17   : > { %p785_p4 = pnand %p784_p3, %p783_p2  ;;  %p789_p8 = scmp.lt.u32.totalorder %s787_s20, %s782_s12 }
  0x18   : > { %p791_p9 = scmp.lt.u32.totalorder %s782_s12, %s976_s7 }
  0x19   : > { %p786_p5 = pneg %p785_p4  ;;  %p790_p10 = por %p789_p8, %p788_p7 }
  0x1b   : > { %p792_p0 = por %p791_p9, %p790_p10 }
  0x1d   : > { %p793_p1 = pnand %p792_p0, %p786_p5 }
  0x1f   : > { %796 = shalt.err (!%p793_p1)
}
  0x20   : > { %s797_s28 = scalar_lea.vmem %s983_s10, 96  ;;  %s880_s29 = smov [#allocation2]  }
  0x21   : > { %p798_p2 = scmp.ne.s32.totalorder %s983_s10, %s797_s28  ;;  %s802_s30 = sshll.u32 %s880_s29, 4  ;;  %s803_s30 = int_to_ptr.vmem [resolvable:$false] %s802_s30 }
  0x22   : > { %s804_s5 = scalar_lea.vmem %s803_s30, 192  ;;  %p805_p11 = scmp.lt.s32.totalorder %s983_s10, %s803_s30 }
  0x23   : > { %p800_p4 = pnand %p798_p2, %p784_p3  ;;  %p806_p7 = scmp.lt.s32.totalorder %s804_s5, %s797_s28 }
  0x25   : > { %p801_p12 = pneg %p800_p4  ;;  %p807_p8 = por %p806_p7, %p805_p11 }
  0x27   : > { %p808_p9 = pnand %p807_p8, %p801_p12 }
  0x29   : > { %811 = shalt.err (!%p808_p9)
}
  0x2a   : > { %720 = dma.hbm_to_vmem [thread:$0]  (!%p978_p13), %s976_s7, 96, %s983_s10, %s163_s11  }
  0x2b   : > { %p1111_p0 = scmp.lt.s32.totalorder %s878_s18, 3  ;;  %p1112_p1 = scmp.ge.s32.totalorder %s878_s18, 1 }
  0x2d   : > { %p180_p3 = pnand %p1112_p1, %p1111_p0 }
  0x2e   : > { %s1016_s6 = sand.u32 (!%p180_p3), 1, %s870_s16  }
  0x2f   : > { %183 = sbr.rel (%p180_p3) target bundleno = 769 (0x301), region = 36  ;;  %s186_s12 = scalar_lea.sflag (!%p180_p3), [#allocation3], %s1016_s6 }
  0x30   : > { %s710_s9 = smul.u32 (!%p180_p3), 6, %s1016_s6 }
  0x32   : > { %s189_s13 = scalar_lea.vmem (!%p180_p3), [#allocation2], %s710_s9 }
  0x36   : > { %857 = dma.done.wait (%p956_p6), %s186_s12, 96  }
  0x37   : > { %859 = vsyncadd (%p956_p6), %s186_s12, 4294967200  ;;  %v221_v0 = vlaneseq  ;;  %v881_v1 = vmov 1983009808   ;;  %v882_v6 = vmov 0.0   ;;  %v215_v7 = vld [vmem:[%s189_s13] sm:$0x3f] }
  0x38   : > { %v219_v2 = vunpack.c.l.s4 %v881_v1  ;;  %685 = vmatprep.subr.bf16.mxu1 %v882_v6  ;;  %v233_v9 = vcombine.low %v215_v7, %v215_v7  ;;  %v217_v10 = vcombine.high %v215_v7, %v215_v7  ;;  %s883_s7 = smov 110   ;;  %vm884_vm0 = vmmov 0   ;;  %s886_s25 = smov 92   ;;  %v279_v33 = vld [vmem:[%s1102_s1] sm:$0x3] }
  0x39   : > { %v222_v3 = vshrl.u32 %v221_v0, 7  ;;  %687 = vmatprep.mubr.msk.bf16.mxu1 %vm884_vm0, %v882_v6  ;;  %v885_v15 = vmov 0   ;;  %vm262_vm1 = vcmask 1041408   ;;  %vm248_vm2 = vcmask 900096   ;;  %s888_s11 = smov 127   ;;  %s889_s14 = smov 126  }
  0x3a   : > { %v220_v4 = vunpack.c.0.s8 %v219_v2  ;;  %323 = vmatprep.mubr.bf16.mxu0 %v885_v15  ;;  %779 = vset.pattern.permute.xlu0 %v885_v15  ;;  %vm272_vm3 = vcmask 1043456   ;;  %vm284_vm4 = vcmask 1045504   ;;  %vm259_vm5 = vcmask 752640   ;;  %v403_v51 = vld [vmem:[%s1104_s3] sm:$0xff]  ;;  %s711_s29 = smul.u32 12, %s1016_s6  ;;  %p1113_p11 = scmp.ne.s32.totalorder %s1108_s26, 0 }
  0x3b   : > { %vm280_vm6 = vcmask 97280   ;;  %v887_v43 = vmov 0.0|0.0   ;;  %vm384_vm7 = vcmask 1039360   ;;  %vm396_vm8 = vcmask 1031168   ;;  %s712_s30 = smul.u32 192, %s938_s19  ;;  %s576_s19 = scalar_lea.sflag [#allocation4], %s1016_s6 }
  0x3c   : > { %v223_v5 = vsub.s32 %v220_v4, %v222_v3  ;;  %vm890_vm9 = vmmov 1   ;;  %vm573_vm11 = vcmask 257024   ;;  %s213_s5 = scalar_lea.vmem [#allocation5], %s711_s29  ;;  %s891_s8 = smov [#allocation5]  }
  0x3d   : > { %vm699_vm10 = vmpackc.low %vm272_vm3, %vm890_vm9  ;;  %s590_s9 = sshll.u32 %s213_s5, 4  ;;  %s816_s10 = sshll.u32 %s891_s8, 4  ;;  %s1059_s9 = int_to_ptr.vmem [resolvable:$true] %s590_s9  ;;  %s817_s10 = int_to_ptr.vmem [resolvable:$false] %s816_s10 }
  0x3e   : > { %v224_v8 = vrot.slane %v215_v7, %v223_v5  ;;  %v240_v11 = vrot.slane %v233_v9, %v223_v5  ;;  %v231_v13 = vrot.slane %v217_v10, %v223_v5  ;;  %p819_p5 = scmp.lt.s32.totalorder %s1059_s9, %s817_s10 }
  0x40   : > { %246 = vrot.lane.b32.xlu1 %v224_v8, %s883_s7  ;;  %v251_v12 = vcombine.low %v224_v8, %v224_v8  ;;  %242 = vrot.lane.b32.xlu0 %v240_v11, %s883_s7  ;;  %v241_v14 = vcombine.high %v240_v11, %v240_v11  ;;  %v252_v16 = vcombine.low %v231_v13, %v231_v13 }
  0x41   : > { %v232_v21 = vcombine.high %v224_v8, %v224_v8 }
  0x44   : > { %253 = vrot.lane.b32.xlu1 %v251_v12, %s886_s25  ;;  %244 = vrot.lane.b32.xlu0 %v241_v14, %s883_s7  ;;  %s1057_s7 = scalar_lea.hbm %s1105_s4, %s712_s30 }
  0x48   : > { %257 = vrot.lane.b32.xlu1 %v252_v16, %s886_s25  ;;  %255 = vrot.lane.b32.xlu0 %v224_v8, %s886_s25  ;;  %s812_s25 = scalar_lea.vmem %s1059_s9, 192 }
  0x49   : > { %p813_p6 = scmp.ne.s32.totalorder %s1059_s9, %s812_s25 }
  0x4b   : > { %p814_p12 = pnand %p813_p6, %p1113_p11 }
  0x4d   : > { %p815_p13 = pneg %p814_p12 }
  0xb2   : > { %v247_v17 = vpop.permute.xlu1 %246  ;;  %v243_v18 = vpop.permute.xlu0 %242 }
  0xb3   : > { %v271_v22 = vsel %vm262_vm1, %v231_v13, %v247_v17 }
  0xb6   : > { %v254_v19 = vpop.permute.xlu1 %253  ;;  %v245_v20 = vpop.permute.xlu0 %244 }
  0xb7   : > { %v249_v23 = vsel %vm248_vm2, %v243_v18, %v245_v20  ;;  %v250_v24 = vsel %vm248_vm2, %v245_v20, %v247_v17 }
  0xb8   : > { %v268_v31 = vsel %vm262_vm1, %v232_v21, %v250_v24  ;;  %v265_v32 = vsel %vm262_vm1, %v224_v8, %v249_v23 }
  0xba   : > { %v258_v25 = vpop.permute.xlu1 %257  ;;  %v256_v27 = vpop.permute.xlu0 %255 }
  0xbb   : > { %v278_v26 = vsel %vm272_vm3, %v271_v22, %v258_v25  ;;  %v260_v29 = vsel %vm259_vm5, %v254_v19, %v256_v27  ;;  %v261_v30 = vsel %vm259_vm5, %v256_v27, %v258_v25 }
  0xbc   : > { %v289_v28 = vsel %vm284_vm4, %v278_v26, 0  ;;  %v276_v34 = vsel %vm272_vm3, %v268_v31, %v261_v30  ;;  %v274_v35 = vsel %vm272_vm3, %v265_v32, %v260_v29 }
  0xbd   : > { %686 = vmatpush3.bf16.msra.mxu1 %v289_v28  ;;  %665 = vmatprep.subr.msk.bf16.mxu0 %vm284_vm4, %v276_v34  ;;  %v285_v36 = vsel %vm284_vm4, %v274_v35, 0 }
  0xbe   : > { %292 = vmatpush1.bf16.msra.mxu0 %v285_v36  ;;  %704 = vmatprep.subr.bf16.mxu1 %v887_v43 }
  0xc0   : > { %688 = vmatmul.mubr.msk.bf16.vlgmr.msra.gmra.mrb[0].mxu1 %vm280_vm6, %v279_v33 }
  0xc1   : > { %695 = vmatprep.mubr.msk.f32.mxu1 %vm884_vm0, %v882_v6  ;;  %666 = vmatmul.mubr.msk.bf16.vlgmr.msra.gmra.mrb[0].mxu0 %vm280_vm6, %v279_v33 }
  0xc2   : > { %482 = vmatprep.mubr.f32.mxu0 %v882_v6  ;;  %v402_v6 = vld [vmem:[%s1103_s2] sm:$0xff] }
 0x193   : > { %v366_v37 = vpop.f32.mrb[0].mxu1 }
 0x194   : > { %v689_v38 = vpop.f32.mrb[1].mxu1  ;;  %v377_v40 = vrot.slane %v366_v37, 4  ;;  %v325_v41 = vpop.f32.mrb[0].mxu0 }
 0x195   : > { %v369_v39 = vpop.f32.mrb[2].mxu1  ;;  %v375_v44 = vrot.slane %v325_v41, 4  ;;  %v327_v45 = vpop.f32.mrb[1].mxu0 }
 0x196   : > { %v690_v42 = vpop.f32.mrb[3].mxu1  ;;  %v774_v46 = vpack.i.bf16 %v366_v37, %v327_v45  ;;  %v376_v47 = vrot.slane %v327_v45, 4  ;;  %v329_v48 = vpop.f32.mrb[2].mxu0 }
 0x197   : > { %378 = vrot.lane.b32.xlu1 %v375_v44, %s888_s11  ;;  %v330_v49 = vpop.f32.mrb[3].mxu0 }
 0x198   : > { %v769_v50 = vpack.i.bf16 %v377_v40, %v376_v47 }
 0x19a   : > { %770 = vrot.lane.b32.xlu0 %v769_v50, %s888_s11  ;;  %s818_s11 = scalar_lea.vmem %s817_s10, 384 }
 0x19b   : > { %390 = vrot.lane.b32.xlu1 %v325_v41, %s889_s14  ;;  %p820_p10 = scmp.lt.s32.totalorder %s818_s11, %s812_s25 }
 0x19d   : > { %p821_p2 = por %p820_p10, %p819_p5 }
 0x19e   : > { %775 = vrot.lane.b32.xlu0 %v774_v46, %s889_s14 }
 0x19f   : > { %p822_p4 = pnand %p821_p2, %p815_p13 }
 0x1a2   : > { %406 = vperm.xlu0 %779, %v403_v51  }
 0x209   : > { %v379_v52 = vpop.permute.xlu1 %378 }
 0x20c   : > { %v771_v53 = vpop.permute.xlu0 %770 }
 0x20d   : > { %v773_v54 = vunpack.i.h.bf16 %v771_v53  ;;  %v772_v55 = vunpack.i.l.bf16 %v771_v53  ;;  %v391_v61 = vpop.permute.xlu1 %390 }
 0x20f   : > { %v385_v56 = vsel %vm384_vm7, %v379_v52, %v772_v55  ;;  %v386_v57 = vsel %vm384_vm7, %v772_v55, %v773_v54  ;;  %v401_v63 = vsel %vm272_vm3, %v366_v37, %v773_v54 }
 0x210   : > { %v776_v58 = vpop.permute.xlu0 %775  ;;  %v399_v62 = vsel %vm272_vm3, %v325_v41, %v385_v56  ;;  %v400_v2 = vsel %vm272_vm3, %v327_v45, %v386_v57 }
 0x211   : > { %v778_v59 = vunpack.i.h.bf16 %v776_v58  ;;  %v777_v60 = vunpack.i.l.bf16 %v776_v58 }
 0x213   : > { %v397_v0 = vsel %vm396_vm8, %v391_v61, %v777_v60  ;;  %v398_v1 = vsel %vm396_vm8, %v777_v60, %v778_v59  ;;  %v705_v3 = vpack.c.bf16 %v778_v59, %v401_v63 }
 0x214   : > { %v698_v4 = vpack.c.bf16 %v398_v1, %v400_v2  ;;  %v701_v5 = vpack.c.bf16 %v397_v0, %v399_v62 }
 0x215   : > { %707 = vmatpush3.bf16.msk.msra.mxu1 %vm699_vm10, %v705_v3 }
 0x216   : > { %700 = vmatprep.subr.msk.bf16.mxu0 %vm699_vm10, %v698_v4 }
 0x217   : > { %703 = vmatpush1.bf16.msk.msra.mxu0 %vm699_vm10, %v701_v5 }
 0x218   : > { %696 = vmatmul.mubr.msk.f32.vlgmr.msra.gmra.mrb[4].mxu1 %vm280_vm6, %v402_v6 }
 0x21a   : > { %670 = vmatmul.mubr.msk.f32.vlgmr.msra.gmra.mrb[4].mxu0 %vm280_vm6, %v402_v6 }
 0x221   : > { %v407_v7 = vpop.permute.xlu0 %406 }
 0x2eb   : > { %v555_v8 = vpop.f32.mrb[4].mxu1 }
 0x2ec   : > { %v556_v9 = vadd.f32 %v555_v8, %v407_v7  ;;  %v697_v10 = vpop.f32.mrb[5].mxu1 }
 0x2ed   : > { %v484_v11 = vpop.f32.mrb[4].mxu0 }
 0x2ee   : > { %v485_v12 = vadd.f32 %v484_v11, %v407_v7  ;;  %v486_v13 = vpop.f32.mrb[5].mxu0  ;;  %v679_v14 = vpack.c.bf16 %v556_v9, %v556_v9 }
 0x2ef   : > { %v487_v15 = vadd.f32 %v486_v13, %v407_v7 }
 0x2f0   : > { %574 = vst.msk [vmem:[%s213_s5 + $0x8] sm:$0xf] %vm573_vm11, %v679_v14 }
 0x2f1   : > { %v678_v16 = vpack.c.bf16 %v487_v15, %v485_v12 }
 0x2f3   : > { %572 = vst [vmem:[%s213_s5] sm:$0xff] %v678_v16 }
 0x2f4   : > { %825 = shalt.err (!%p822_p4)
}
 0x2f5   : > { %s826_s6 = scalar_lea.hbm %s1057_s7, 192  ;;  %s830_s22 = scalar_lea.hbm %s1105_s4, 384 }
 0x2f6   : > { %p827_p7 = scmp.ne.s32.totalorder %s1057_s7, %s826_s6  ;;  %p831_p0 = scmp.lt.u32.totalorder %s1057_s7, %s1105_s4 }
 0x2f7   : > { %p832_p1 = scmp.lt.u32.totalorder %s830_s22, %s826_s6  ;;  %p834_p6 = scmp.lt.u32.totalorder %s826_s6, %s1057_s7 }
 0x2f8   : > { %p828_p8 = pnand %p827_p7, %p1113_p11 }
 0x2f9   : > { %p833_p3 = por %p832_p1, %p831_p0 }
 0x2fa   : > { %p829_p9 = pneg %p828_p8 }
 0x2fb   : > { %p835_p12 = por %p834_p6, %p833_p3 }
 0x2fd   : > { %p836_p13 = pnand %p835_p12, %p829_p9 }
 0x2ff   : > { %839 = shalt.err (!%p836_p13)
}
 0x300   : > { %715 = dma.vmem_to_hbm [thread:$0]  (%p1113_p11), %s1059_s9, 192, %s1057_s7, %s576_s19  }
 0x301 PF: > { %s602_s29 = sand.u32 1, %s866_s15   ;;  %p1114_p5 = scmp.ne.s32.totalorder %s1109_s27, 0 }
 0x302   : > { %p1115_p10 = scmp.ge.s32.totalorder %s878_s18, 2  ;;  %s603_s30 = scalar_lea.sflag [#allocation4], %s602_s29 }
 0x304   : > { %p722_p2 = pnand %p1115_p10, %p1114_p5 }
 0x306   : > { %861 = dma.done.wait (!%p722_p2), %s603_s30, 192  }
 0x307   : > { %863 = vsyncadd (!%p722_p2), %s603_s30, 4294967104  ;;  %p17_p4 = scmp.ge.s32.totalorder %s942_s21, 4   ;;  %s1116_s15 = smov %s870_s16 }
 0x308   : > { %s1117_s16 = smov %s874_s17  ;;  %s1118_s17 = smov %s954_s24 }
 0x309   : > { %s1119_s18 = smov %s942_s21  ;;  %19 = sbr.rel (!%p17_p4) target bundleno = 5 (0x5), region = 81 }
 0x310   :  { %608 = vsyncpa [#allocation3], 1 }
 0x311   :  { %610 = vsyncpa [#allocation3 + $0x1], 1 }
 0x312   :  { %611 = vsyncpa [#allocation4], 1 }
 0x313   :  { %613 = vsyncpa [#allocation4 + $0x1], 1 }

</bundles_post_ra>
